<compile_context>
chip_gen: v6e
topology: v6e:2x2x1
jax: 0.10.0
libtpu: 0.0.40
codegen_flags: <defaults>
</compile_context>

<pallas_src>
import functools
import math

import jax
import jax.numpy as jnp
from jax.experimental import pallas as pl
from jax.experimental.pallas import tpu as pltpu


def _round_up(x, m):
    return ((x + m - 1) // m) * m


def _vmem_capacity_bytes():
    # Generation-aware VMEM cap (v5e/v6e: 128 MiB, v7x: 64 MiB); conservative fallback.
    try:
        info = pltpu.get_tpu_info()
        cap = getattr(info, "vmem_capacity_bytes", None)
        if cap:
            return int(cap)
    except Exception:
        pass
    return 64 << 20


def _bilinear_sigmoid_kernel(a_ref, b_ref, w_ref, e_ref, o_ref):
    # a_ref, b_ref: (TG, LW) packed batch tiles (LW = pack*D lanes; dense when D | 128).
    # w_ref:        (LW, LW) block-diagonal bilinear weight, resident across the grid.
    # e_ref:        (pack, LW) 0/1 slot-selector matrix (row k selects lanes of slot k).
    # o_ref:        (pack, TG) lane-dense output tile.
    #
    # MXU: t[g, k*D + j] = sum_i a[g*pack + k, i] * W[i, j]   (native bf16 path if inputs
    # are bf16; f32 accumulation via preferred_element_type).
    t = jnp.dot(a_ref[...], w_ref[...], preferred_element_type=jnp.float32)
    # VPU: p[g, c] = t[g, c] * b[g, c]   (b auto-promotes to f32; no explicit upcast).
    p = t * b_ref[...]
    # MXU: s[k, g] = sum_j p[g, k*D + j]  — reduces over D and lands the per-row scalars
    # lane-major, so the store below is an unmasked dense vst.
    s = jax.lax.dot_general(
        e_ref[...], p,
        dimension_numbers=(((1,), (1,)), ((), ())),
        preferred_element_type=jnp.float32,
    )
    # Sigmoid: exp goes to the EUP slot; exact math (overflow saturates correctly).
    o_ref[...] = (1.0 / (1.0 + jnp.exp(-s))).astype(o_ref.dtype)


@functools.partial(jax.jit, static_argnames=("block_rows",))
def discriminator_forward(a, b, w, *, block_rows=8192):
    """Bilinear(a, b; W) + sigmoid.  a, b: (N, D) f32/bf16; w: (D, D). Returns (N, 1) f32."""
    N, D = a.shape
    assert b.shape == (N, D) and w.shape == (D, D)

    in_dtype = jnp.promote_types(a.dtype, b.dtype)

    # ---- lane packing: pack `pack` rows into one 128-lane row when D divides 128 ----
    pack = 1
    if D <= 64 and 128 % D == 0:
        pack = 128 // D
        while pack > 1 and N % pack != 0:
            pack //= 2
    lane_w = pack * D
    n_groups = N // pack

    # Contiguous reshape (no copy); no jnp.pad of the inputs — ragged tails are handled
    # by Pallas edge-block clamping (garbage stays in discarded output lanes).
    a_p = a.astype(in_dtype).reshape(n_groups, lane_w)
    b_p = b.astype(in_dtype).reshape(n_groups, lane_w)

    # Block-diagonal weight (pack copies of W) in the *input* dtype so bf16 inputs take
    # the native bf16 MXU path; slot-selector matrix for the per-row reduction.
    w_bd = jnp.kron(jnp.eye(pack, dtype=in_dtype), w.astype(in_dtype))
    e_mat = jnp.kron(jnp.eye(pack, dtype=jnp.float32), jnp.ones((1, D), jnp.float32))

    # ---- tile selection (in packed-group units), VMEM-budgeted & generation-aware ----
    lane_pad = _round_up(lane_w, 128)            # correct for any feat_dim (incl. D>128)
    sub_pack = _round_up(pack, 8)
    in_item = jnp.dtype(in_dtype).itemsize

    vmem_cap = max(_vmem_capacity_bytes(), 32 << 20)
    fixed_bytes = (2 * lane_pad * lane_pad * in_item      # resident block-diag W
                   + 2 * sub_pack * lane_pad * 4)         # resident E
    per_group_bytes = 2 * 2 * lane_pad * in_item + 2 * sub_pack * 4   # a,b (+out), 2-buf
    usable = max(int(vmem_cap * 0.6) - fixed_bytes, 2 << 20)
    max_g_vmem = max(128, usable // per_group_bytes)

    desired_g = max(1, block_rows // pack)
    tn_g = min(desired_g, max_g_vmem)
    # Megacore (v7x): guarantee >= 2 batch tiles when there is enough work to share.
    if N >= 2048 and tn_g >= n_groups:
        tn_g = -(-n_groups // 2)
    tn_g = _round_up(max(min(tn_g, n_groups), 1), 128)    # 128-aligned -> dense stores
    num_blocks = -(-n_groups // tn_g)
    n_lanes = num_blocks * tn_g

    vmem_need = (2 * 2 * tn_g * lane_pad * in_item        # a,b tiles, double-buffered
                 + 2 * sub_pack * tn_g * 4                # output tiles
                 + fixed_bytes)
    vmem_limit = int(min(max(2 * vmem_need, 8 << 20), vmem_cap))

    cost = pl.CostEstimate(
        flops=int(2 * n_groups * lane_w * lane_w          # block-diag matmul
                  + 2 * n_groups * lane_w * pack          # slot-selector reduction
                  + 2 * n_groups * lane_w),               # elementwise
        transcendentals=int(N),
        bytes_accessed=int(2 * N * D * in_item + lane_w * lane_w * in_item + N * 4),
    )

    out = pl.pallas_call(
        _bilinear_sigmoid_kernel,
        out_shape=jax.ShapeDtypeStruct((pack, n_lanes), jnp.float32),
        grid_spec=pltpu.PrefetchScalarGridSpec(
            num_scalar_prefetch=0,
            grid=(num_blocks,),
            in_specs=[
                pl.BlockSpec((tn_g, lane_w), lambda i: (i, 0)),
                pl.BlockSpec((tn_g, lane_w), lambda i: (i, 0)),
                pl.BlockSpec((lane_w, lane_w), lambda i: (0, 0)),   # resident W_blockdiag
                pl.BlockSpec((pack, lane_w), lambda i: (0, 0)),     # resident E
            ],
            out_specs=pl.BlockSpec((pack, tn_g), lambda i: (0, i)),
        ),
        compiler_params=pltpu.CompilerParams(
            dimension_semantics=("parallel",),   # batch tiles shard across TCs (v7x)
            vmem_limit_bytes=vmem_limit,
        ),
        cost_estimate=cost,
    )(a_p, b_p, w_bd, e_mat)

    # Drop overhang lanes (edge-block garbage), un-pack: out[k, g] is row g*pack + k.
    out = out[:, :n_groups]
    return out.T.reshape(N, 1)


if __name__ == "__main__":
    key = jax.random.PRNGKey(0)
    k_a, k_b, k_w, k_a2, k_b2, k_a3, k_b3, k_w3 = jax.random.split(key, 8)

    feat_dim = 32  # args.feat_dim
    bound = 1.0 / math.sqrt(feat_dim)
    # nn.Bilinear(feat_dim, feat_dim, 1, bias=False): weight (1, D, D) ~ U(-1/sqrt(D), 1/sqrt(D))
    w = jax.random.uniform(k_w, (1, feat_dim, feat_dim), dtype=jnp.float32,
                           minval=-bound, maxval=bound)[0]

    def ref_fn(a, b, w):
        t = jnp.dot(a.astype(jnp.float32), w.astype(jnp.float32),
                    precision=jax.lax.Precision.HIGHEST)
        return jax.nn.sigmoid(jnp.sum(t * b.astype(jnp.float32), axis=-1, keepdims=True))

    # 1) Small ragged batch (N % 128 != 0), packed layout, single tile.
    N = 300
    a = jax.random.normal(k_a, (N, feat_dim), dtype=jnp.float32)   # embed3
    b = jax.random.normal(k_b, (N, feat_dim), dtype=jnp.float32)   # embed2
    out = jax.block_until_ready(discriminator_forward(a, b, w))
    assert out.shape == (N, 1)
    ref = ref_fn(a, b, w)
    assert jnp.allclose(out, ref, atol=2e-5, rtol=1e-5), float(jnp.max(jnp.abs(out - ref)))

    # 2) Multi-tile grid with a ragged last tile (no input padding copy).
    N2 = 1040
    a2 = jax.random.normal(k_a2, (N2, feat_dim), dtype=jnp.float32)
    b2 = jax.random.normal(k_b2, (N2, feat_dim), dtype=jnp.float32)
    out2 = jax.block_until_ready(discriminator_forward(a2, b2, w, block_rows=512))
    ref2 = ref_fn(a2, b2, w)
    assert out2.shape == (N2, 1)
    assert jnp.allclose(out2, ref2, atol=2e-5, rtol=1e-5), float(jnp.max(jnp.abs(out2 - ref2)))

    # 3) bf16 fast path: inputs and W hit the MXU as bf16, accumulation stays f32.
    out_bf16 = jax.block_until_ready(
        discriminator_forward(a.astype(jnp.bfloat16), b.astype(jnp.bfloat16), w))
    assert out_bf16.shape == (N, 1)
    assert jnp.allclose(out_bf16, ref, atol=5e-2), float(jnp.max(jnp.abs(out_bf16 - ref)))

    # 4) Unpacked fallback path (feat_dim does not divide 128).
    D3, N3 = 20, 77
    w3 = jax.random.uniform(k_w3, (D3, D3), dtype=jnp.float32,
                            minval=-1.0 / math.sqrt(D3), maxval=1.0 / math.sqrt(D3))
    a3 = jax.random.normal(k_a3, (N3, D3), dtype=jnp.float32)
    b3 = jax.random.normal(k_b3, (N3, D3), dtype=jnp.float32)
    out3 = jax.block_until_ready(discriminator_forward(a3, b3, w3))
    ref3 = ref_fn(a3, b3, w3)
    assert out3.shape == (N3, 1)
    assert jnp.allclose(out3, ref3, atol=2e-5, rtol=1e-5), float(jnp.max(jnp.abs(out3 - ref3)))

    print("KERNEL_OK")
</pallas_src>

<mosaic_0001>
module attributes {stable_mosaic.version = 11 : i64} {
  func.func @_bilinear_sigmoid_kernel(%arg0: i32, %arg1: memref<128x128xf32, #tpu.memory_space<vmem>>, %arg2: memref<128x128xf32, #tpu.memory_space<vmem>>, %arg3: memref<128x128xf32, #tpu.memory_space<vmem>>, %arg4: memref<4x128xf32, #tpu.memory_space<vmem>>, %arg5: memref<4x128xf32, #tpu.memory_space<vmem>>) attributes {dimension_semantics = [#tpu.dimension_semantics<parallel>], iteration_bounds = array<i64: 1>, scalar_prefetch = 0 : i64, scratch_operands = 0 : i64, tpu.core_type = #tpu.core_type<tc>, window_params = [{transform_indices = @transform_0, window_bounds = array<i64: 128, 128>}, {transform_indices = @transform_1, window_bounds = array<i64: 128, 128>}, {pipeline_mode = #tpu.pipeline_mode<synchronous>, transform_indices = @transform_2, window_bounds = array<i64: 128, 128>}, {pipeline_mode = #tpu.pipeline_mode<synchronous>, transform_indices = @transform_3, window_bounds = array<i64: 4, 128>}, {transform_indices = @transform_4, window_bounds = array<i64: 4, 128>}]} {
    %c0 = arith.constant 0 : index
    %c0_0 = arith.constant 0 : index
    %0 = vector.load %arg1[%c0, %c0_0] : memref<128x128xf32, #tpu.memory_space<vmem>>, vector<128x128xf32>
    %c0_1 = arith.constant 0 : index
    %c0_2 = arith.constant 0 : index
    %1 = vector.load %arg3[%c0_1, %c0_2] : memref<128x128xf32, #tpu.memory_space<vmem>>, vector<128x128xf32>
    %cst = arith.constant dense<0.000000e+00> : vector<128x128xf32>
    %2 = tpu.matmul %0, %1, %cst {dimension_numbers = #tpu.dot_dimension_numbers<[1], [0], [0], [1], [0, 0, 1, 1], [], []>} : vector<128x128xf32>, vector<128x128xf32>, vector<128x128xf32> -> vector<128x128xf32>
    %c0_3 = arith.constant 0 : index
    %c0_4 = arith.constant 0 : index
    %3 = vector.load %arg2[%c0_3, %c0_4] : memref<128x128xf32, #tpu.memory_space<vmem>>, vector<128x128xf32>
    %4 = arith.mulf %2, %3 : vector<128x128xf32>
    %c0_5 = arith.constant 0 : index
    %c0_6 = arith.constant 0 : index
    %5 = vector.load %arg4[%c0_5, %c0_6] : memref<4x128xf32, #tpu.memory_space<vmem>>, vector<4x128xf32>
    %cst_7 = arith.constant dense<0.000000e+00> : vector<4x128xf32>
    %6 = tpu.matmul %5, %4, %cst_7 {dimension_numbers = #tpu.dot_dimension_numbers<[1], [1], [0], [0], [0, 0, 1, 0], [], []>} : vector<4x128xf32>, vector<128x128xf32>, vector<4x128xf32> -> vector<4x128xf32>
    %cst_8 = arith.constant 0.000000e+00 : f32
    %7 = vector.broadcast %cst_8 : f32 to vector<4x128xf32>
    %8 = arith.subf %7, %6 : vector<4x128xf32>
    %9 = math.exp %8 : vector<4x128xf32>
    %cst_9 = arith.constant 1.000000e+00 : f32
    %10 = vector.broadcast %cst_9 : f32 to vector<4x128xf32>
    %11 = arith.addf %10, %9 : vector<4x128xf32>
    %cst_10 = arith.constant 1.000000e+00 : f32
    %12 = vector.broadcast %cst_10 : f32 to vector<4x128xf32>
    %13 = arith.divf %12, %11 : vector<4x128xf32>
    %c0_11 = arith.constant 0 : index
    %c0_12 = arith.constant 0 : index
    %14 = vector.load %arg5[%c0_11, %c0_12] : memref<4x128xf32, #tpu.memory_space<vmem>>, vector<4x128xf32>
    tpu.vector_store %arg5[%c0_11, %c0_12], %13 {strides = array<i32>} : memref<4x128xf32, #tpu.memory_space<vmem>>, vector<4x128xf32>,
    return
  }
  func.func @transform_0(%arg0: i32) -> (i32, i32) {
    %c0_i32 = arith.constant 0 : i32
    %c0_i32_0 = arith.constant 0 : i32
    return %arg0, %c0_i32 : i32, i32
  }
  func.func @transform_1(%arg0: i32) -> (i32, i32) {
    %c0_i32 = arith.constant 0 : i32
    %c0_i32_0 = arith.constant 0 : i32
    return %arg0, %c0_i32 : i32, i32
  }
  func.func @transform_2(%arg0: i32) -> (i32, i32) {
    %c0_i32 = arith.constant 0 : i32
    %c0_i32_0 = arith.constant 0 : i32
    %c0_i32_1 = arith.constant 0 : i32
    return %c0_i32, %c0_i32_0 : i32, i32
  }
  func.func @transform_3(%arg0: i32) -> (i32, i32) {
    %c0_i32 = arith.constant 0 : i32
    %c0_i32_0 = arith.constant 0 : i32
    %c0_i32_1 = arith.constant 0 : i32
    return %c0_i32, %c0_i32_0 : i32, i32
  }
  func.func @transform_4(%arg0: i32) -> (i32, i32) {
    %c0_i32 = arith.constant 0 : i32
    %c0_i32_0 = arith.constant 0 : i32
    return %c0_i32, %arg0 : i32, i32
  }
}

</mosaic_0001>

<bundles_post_ra>
// kernel: discriminator_forward.1
= control target key start
LH: loop header
LB: loop body
LE: loop exit
PB: predicated region body
PF: predicated region fallthrough
CT: control target
= control target key end

     0   :  { %v454_v32 = vmov 0.0   ;;  %vm455_vm0 = vmmov 0   ;;  %s660_s2 = inlined_call_operand.vmem [shape: f32[128,128], index: 2, kind: input, shape index: {}]   ;;  %s661_s0 = inlined_call_operand.vmem [shape: f32[75,128], index: 0, kind: input, shape index: {}]   ;;  %s662_s1 = inlined_call_operand.vmem [shape: f32[75,128], index: 1, kind: input, shape index: {}]   ;;  %s663_s3 = inlined_call_operand.vmem [shape: f32[4,128], index: 3, kind: input, shape index: {}]   ;;  %s664_s4 = inlined_call_operand.vmem [shape: f32[4,128], index: 4, kind: output, shape index: {}]  }
   0x1   :  { %v48_v0 = vld [vmem:[%s660_s2 + $0x78] sm:$0xff]  ;;  %v47_v1 = vld [vmem:[%s660_s2 + $0x70] sm:$0xff]  ;;  %v46_v2 = vld [vmem:[%s660_s2 + $0x68] sm:$0xff]  ;;  %413 = vmatprep.subr.mxu1 %v454_v32  ;;  %445 = vmatprep.mubr.msk.f32.mxu1 %vm455_vm0, %v454_v32 }
   0x2   :  { %357 = vmatprep.subr.mxu0 %v48_v0  ;;  %v45_v3 = vld [vmem:[%s660_s2 + $0x60] sm:$0xff]  ;;  %v44_v5 = vld [vmem:[%s660_s2 + $0x58] sm:$0xff]  ;;  %v43_v6 = vld [vmem:[%s660_s2 + $0x50] sm:$0xff] }
   0x3   :  { %358 = vmatpush3.msra.mxu0 %v48_v0  ;;  %v17_v4 = vld [vmem:[%s661_s0] sm:$0xff]  ;;  %v42_v7 = vld [vmem:[%s660_s2 + $0x48] sm:$0xff]  ;;  %v40_v9 = vld [vmem:[%s660_s2 + $0x38] sm:$0xff] }
   0x4   :  { %359 = vmatprep.subr.mxu0 %v47_v1  ;;  %389 = vmatprep.mubr.f32.mxu0 %v17_v4  ;;  %v41_v8 = vld [vmem:[%s660_s2 + $0x40] sm:$0xff]  ;;  %v39_v10 = vld [vmem:[%s660_s2 + $0x30] sm:$0xff]  ;;  %v38_v11 = vld [vmem:[%s660_s2 + $0x28] sm:$0xff] }
   0x5   :  { %360 = vmatpush3.msra.mxu0 %v47_v1  ;;  %v37_v12 = vld [vmem:[%s660_s2 + $0x20] sm:$0xff]  ;;  %v36_v13 = vld [vmem:[%s660_s2 + $0x18] sm:$0xff]  ;;  %v35_v14 = vld [vmem:[%s660_s2 + $0x10] sm:$0xff] }
   0x6   :  { %361 = vmatprep.subr.mxu0 %v46_v2  ;;  %v34_v15 = vld [vmem:[%s660_s2 + $0x8] sm:$0xff]  ;;  %v33_v16 = vld [vmem:[%s660_s2] sm:$0xff]  ;;  %v19_v18 = vld [vmem:[%s661_s0 + $0x10] sm:$0xff] }
   0x7   :  { %362 = vmatpush3.msra.mxu0 %v46_v2  ;;  %v18_v17 = vld [vmem:[%s661_s0 + $0x8] sm:$0xff]  ;;  %v20_v19 = vld [vmem:[%s661_s0 + $0x18] sm:$0xff]  ;;  %v21_v20 = vld [vmem:[%s661_s0 + $0x20] sm:$0xff] }
   0x8   :  { %363 = vmatprep.subr.mxu0 %v45_v3  ;;  %v22_v21 = vld [vmem:[%s661_s0 + $0x28] sm:$0xff]  ;;  %v23_v22 = vld [vmem:[%s661_s0 + $0x30] sm:$0xff]  ;;  %v24_v23 = vld [vmem:[%s661_s0 + $0x38] sm:$0xff] }
   0x9   :  { %364 = vmatpush3.msra.mxu0 %v45_v3  ;;  %v25_v24 = vld [vmem:[%s661_s0 + $0x40] sm:$0xff]  ;;  %v26_v25 = vld [vmem:[%s661_s0 + $0x48] sm:$0xff]  ;;  %v27_v26 = vld [vmem:[%s661_s0 + $0x50] sm:$0xff] }
   0xa   :  { %365 = vmatprep.subr.mxu0 %v44_v5  ;;  %v28_v27 = vld [vmem:[%s661_s0 + $0x58] sm:$0xff]  ;;  %v29_v28 = vld [vmem:[%s661_s0 + $0x60] sm:$0xff]  ;;  %v30_v29 = vld [vmem:[%s661_s0 + $0x68] sm:$0xff] }
   0xb   :  { %366 = vmatpush3.msra.mxu0 %v44_v5  ;;  %v31_v30 = vld [vmem:[%s661_s0 + $0x70] sm:$0xff]  ;;  %v32_v31 = vld [vmem:[%s661_s0 + $0x78] sm:$0xff]  ;;  %v207_v53 = vld [vmem:[%s662_s1 + $0x68] sm:$0xff] }
   0xc   :  { %367 = vmatprep.subr.mxu0 %v43_v6  ;;  %v209_v47 = vld [vmem:[%s662_s1 + $0x78] sm:$0xff]  ;;  %v208_v51 = vld [vmem:[%s662_s1 + $0x70] sm:$0xff]  ;;  %v206_v55 = vld [vmem:[%s662_s1 + $0x60] sm:$0xff] }
   0xd   :  { %368 = vmatpush3.msra.mxu0 %v43_v6  ;;  %v205_v57 = vld [vmem:[%s662_s1 + $0x58] sm:$0xff]  ;;  %v204_v59 = vld [vmem:[%s662_s1 + $0x50] sm:$0xff]  ;;  %v203_v61 = vld [vmem:[%s662_s1 + $0x48] sm:$0xff] }
   0xe   :  { %369 = vmatprep.subr.mxu0 %v42_v7  ;;  %v202_v63 = vld [vmem:[%s662_s1 + $0x40] sm:$0xff]  ;;  %v201_v1 = vld [vmem:[%s662_s1 + $0x38] sm:$0xff]  ;;  %v200_v3 = vld [vmem:[%s662_s1 + $0x30] sm:$0xff] }
   0xf   :  { %370 = vmatpush3.msra.mxu0 %v42_v7  ;;  %v199_v5 = vld [vmem:[%s662_s1 + $0x28] sm:$0xff]  ;;  %v198_v7 = vld [vmem:[%s662_s1 + $0x20] sm:$0xff] }
  0x10   :  { %371 = vmatprep.subr.mxu0 %v41_v8 }
  0x11   :  { %372 = vmatpush3.msra.mxu0 %v41_v8 }
  0x12   :  { %373 = vmatprep.subr.mxu0 %v40_v9 }
  0x13   :  { %374 = vmatpush3.msra.mxu0 %v40_v9  ;;  %v197_v9 = vld [vmem:[%s662_s1 + $0x18] sm:$0xff] }
  0x14   :  { %375 = vmatprep.subr.mxu0 %v39_v10 }
  0x15   :  { %376 = vmatpush3.msra.mxu0 %v39_v10 }
  0x16   :  { %377 = vmatprep.subr.mxu0 %v38_v11 }
  0x17   :  { %378 = vmatpush3.msra.mxu0 %v38_v11  ;;  %v196_v11 = vld [vmem:[%s662_s1 + $0x10] sm:$0xff] }
  0x18   :  { %379 = vmatprep.subr.mxu0 %v37_v12 }
  0x19   :  { %380 = vmatpush3.msra.mxu0 %v37_v12 }
  0x1a   :  { %381 = vmatprep.subr.mxu0 %v36_v13 }
  0x1b   :  { %382 = vmatpush3.msra.mxu0 %v36_v13  ;;  %v195_v13 = vld [vmem:[%s662_s1 + $0x8] sm:$0xff] }
  0x1c   :  { %383 = vmatprep.subr.mxu0 %v35_v14 }
  0x1d   :  { %384 = vmatpush3.msra.mxu0 %v35_v14 }
  0x1e   :  { %385 = vmatprep.subr.mxu0 %v34_v15 }
  0x1f   :  { %386 = vmatpush3.msra.mxu0 %v34_v15  ;;  %v194_v15 = vld [vmem:[%s662_s1] sm:$0xff] }
  0x20   :  { %387 = vmatprep.subr.mxu0 %v33_v16 }
  0x21   :  { %388 = vmatpush3.msra.mxu0 %v33_v16 }
  0x22   :  { %390 = vmatmul.mubr.f32.vlgmr.msra.gmra.mxu0 %v18_v17  ;;  %v226_v17 = vld [vmem:[%s663_s3] sm:$0xf] }
  0x23   :  { %392 = vmatprep.mubr.f32.mxu0 %v19_v18 }
  0x26   :  { %393 = vmatmul.mubr.f32.gmra.mxu0 %v20_v19 }
  0x27   :  { %395 = vmatprep.mubr.f32.mxu0 %v21_v20 }
  0x2a   :  { %396 = vmatmul.mubr.f32.gmra.mxu0 %v22_v21 }
  0x2b   :  { %398 = vmatprep.mubr.f32.mxu0 %v23_v22 }
  0x2e   :  { %399 = vmatmul.mubr.f32.gmra.mxu0 %v24_v23 }
  0x2f   :  { %401 = vmatprep.mubr.f32.mxu0 %v25_v24 }
  0x32   :  { %402 = vmatmul.mubr.f32.gmra.mxu0 %v26_v25 }
  0x33   :  { %404 = vmatprep.mubr.f32.mxu0 %v27_v26 }
  0x36   :  { %405 = vmatmul.mubr.f32.gmra.mxu0 %v28_v27 }
  0x37   :  { %407 = vmatprep.mubr.f32.mxu0 %v29_v28 }
  0x3a   :  { %408 = vmatmul.mubr.f32.gmra.mxu0 %v30_v29 }
  0x3b   :  { %410 = vmatprep.mubr.f32.mxu0 %v31_v30 }
  0x3e   :  { %411 = vmatmul.mubr.f32.gmra.mxu0 %v32_v31 }
  0xe2   :  { %v579_v33 = vpop.f32.mrf.mxu0 }
  0xe3   :  { %v211_v14 = vmul.f32 %v579_v33, %v195_v13 }
  0xe4   :  { %v581_v34 = vpop.f32.mrf.mxu0 }
  0xe5   :  { %v210_v16 = vmul.f32 %v194_v15, %v581_v34 }
  0xe6   :  { %v583_v35 = vpop.f32.mrf.mxu0 }
  0xe7   :  { %v213_v10 = vmul.f32 %v583_v35, %v197_v9 }
  0xe8   :  { %v585_v36 = vpop.f32.mrf.mxu0 }
  0xe9   :  { %v212_v12 = vmul.f32 %v196_v11, %v585_v36 }
  0xea   :  { %v397_v37 = vpop.f32.mrf.mxu0 }
  0xeb   :  { %v215_v6 = vmul.f32 %v397_v37, %v199_v5 }
  0xec   :  { %v135_v38 = vpop.f32.mrf.mxu0 }
  0xed   :  { %v214_v8 = vmul.f32 %v198_v7, %v135_v38 }
  0xee   :  { %v400_v39 = vpop.f32.mrf.mxu0 }
  0xef   :  { %v217_v2 = vmul.f32 %v400_v39, %v201_v1 }
  0xf0   :  { %v145_v40 = vpop.f32.mrf.mxu0 }
  0xf1   :  { %v216_v4 = vmul.f32 %v200_v3, %v145_v40 }
  0xf2   :  { %v403_v41 = vpop.f32.mrf.mxu0 }
  0xf3   :  { %v219_v62 = vmul.f32 %v403_v41, %v203_v61 }
  0xf4   :  { %v155_v42 = vpop.f32.mrf.mxu0 }
  0xf5   :  { %v218_v0 = vmul.f32 %v202_v63, %v155_v42 }
  0xf6   :  { %v406_v43 = vpop.f32.mrf.mxu0 }
  0xf7   :  { %v221_v58 = vmul.f32 %v406_v43, %v205_v57 }
  0xf8   :  { %v165_v44 = vpop.f32.mrf.mxu0 }
  0xf9   :  { %v220_v60 = vmul.f32 %v204_v59, %v165_v44 }
  0xfa   :  { %v409_v45 = vpop.f32.mrf.mxu0 }
  0xfb   :  { %v223_v54 = vmul.f32 %v409_v45, %v207_v53 }
  0xfc   :  { %v175_v46 = vpop.f32.mrf.mxu0 }
  0xfd   :  { %v222_v56 = vmul.f32 %v206_v55, %v175_v46 }
  0xfe   :  { %v412_v48 = vpop.f32.mrf.mxu0 }
  0xff   :  { %v225_v49 = vmul.f32 %v412_v48, %v209_v47 }
 0x100   :  { %v185_v50 = vpop.f32.mrf.mxu0 }
 0x101   :  { %414 = vmatpush3.xpose.msra.mxu1 %v225_v49  ;;  %v224_v52 = vmul.f32 %v208_v51, %v185_v50 }
 0x102   :  { %415 = vmatprep.subr.mxu1 %v454_v32 }
 0x105   :  { %416 = vmatpush3.xpose.msra.mxu1 %v224_v52 }
 0x106   :  { %417 = vmatprep.subr.mxu1 %v454_v32 }
 0x109   :  { %418 = vmatpush3.xpose.msra.mxu1 %v223_v54 }
 0x10a   :  { %419 = vmatprep.subr.mxu1 %v454_v32 }
 0x10d   :  { %420 = vmatpush3.xpose.msra.mxu1 %v222_v56 }
 0x10e   :  { %421 = vmatprep.subr.mxu1 %v454_v32 }
 0x111   :  { %422 = vmatpush3.xpose.msra.mxu1 %v221_v58 }
 0x112   :  { %423 = vmatprep.subr.mxu1 %v454_v32 }
 0x115   :  { %424 = vmatpush3.xpose.msra.mxu1 %v220_v60 }
 0x116   :  { %425 = vmatprep.subr.mxu1 %v454_v32 }
 0x119   :  { %426 = vmatpush3.xpose.msra.mxu1 %v219_v62 }
 0x11a   :  { %427 = vmatprep.subr.mxu1 %v454_v32 }
 0x11d   :  { %428 = vmatpush3.xpose.msra.mxu1 %v218_v0 }
 0x11e   :  { %429 = vmatprep.subr.mxu1 %v454_v32 }
 0x121   :  { %430 = vmatpush3.xpose.msra.mxu1 %v217_v2 }
 0x122   :  { %431 = vmatprep.subr.mxu1 %v454_v32 }
 0x125   :  { %432 = vmatpush3.xpose.msra.mxu1 %v216_v4 }
 0x126   :  { %433 = vmatprep.subr.mxu1 %v454_v32 }
 0x129   :  { %434 = vmatpush3.xpose.msra.mxu1 %v215_v6 }
 0x12a   :  { %435 = vmatprep.subr.mxu1 %v454_v32 }
 0x12d   :  { %436 = vmatpush3.xpose.msra.mxu1 %v214_v8 }
 0x12e   :  { %437 = vmatprep.subr.mxu1 %v454_v32 }
 0x131   :  { %438 = vmatpush3.xpose.msra.mxu1 %v213_v10 }
 0x132   :  { %439 = vmatprep.subr.mxu1 %v454_v32 }
 0x135   :  { %440 = vmatpush3.xpose.msra.mxu1 %v212_v12 }
 0x136   :  { %441 = vmatprep.subr.mxu1 %v454_v32 }
 0x139   :  { %442 = vmatpush3.xpose.msra.mxu1 %v211_v14 }
 0x13a   :  { %443 = vmatprep.subr.mxu1 %v454_v32 }
 0x13d   :  { %444 = vmatpush3.xpose.msra.mxu1 %v210_v16 }
 0x140   :  { %446 = vmatmul.mubr.f32.vlgmr.msra.gmra.mxu1 %v226_v17 }
 0x200   :  { %v293_v18 = vpop.f32.mrf.mxu1 }
 0x201   :  { %v297_v19 = vsub.f32 0.0, %v293_v18 }
 0x202   :  { %v447_v20 = vpop.f32.mrf.mxu1 }
 0x203   :  { %v298_v21 = vmul.f32 1.442695, %v297_v19 }
 0x205   :  { %450 = vpow2.f32 %v298_v21 }
 0x212   :  { %v451_v22 = vpop.eup %450 }
 0x213   :  { %v300_v23 = vadd.f32 1.0, %v451_v22 }
 0x215   :  { %452 = vrcp.f32 %v300_v23 }
 0x222   :  { %v453_v24 = vpop.eup %452 }
 0x223   :  { %303 = vst [vmem:[%s664_s4] sm:$0xf] %v453_v24 }

</bundles_post_ra>
